<compile_context>
chip_gen: v7x
topology: tpu7x:2x2x1
jax: 0.10.0
libtpu: 0.0.40
codegen_flags: <defaults>
</compile_context>

<pallas_src>
import functools
import math

import jax
import jax.numpy as jnp
from jax.experimental import pallas as pl
from jax.experimental.pallas import tpu as pltpu


_VMEM = pl.BlockSpec(memory_space=pltpu.MemorySpace.VMEM)


# ----------------------------------------------------------------------------
# Chip-aware defaults (scoped-VMEM defaults 16/32/32 MiB, physical
# 128/128/64 MiB on v5e/v6e/v7x; v5e VPU/EUP has no bf16).
# ----------------------------------------------------------------------------

def _device_kind():
    try:
        return jax.devices()[0].device_kind.lower()
    except Exception:
        return ""


_KIND = _device_kind()
_IS_V5E = ("v5e" in _KIND) or ("v5 lite" in _KIND) or ("v5lite" in _KIND)
_IS_V6 = "v6" in _KIND

if _IS_V5E:
    _FFN_TILE_M = 128              # keep [tm, FFN] fp32 temps small
    _ROW_TILE_M = 256
    _FFN_VMEM = 64 << 20           # raise the 16 MiB default scoped limit
    _GELU_DTYPE = jnp.float32      # no bf16 VPU/EUP on v5e
elif _IS_V6:
    _FFN_TILE_M = 512              # 128 MiB physical: amortize grid overhead
    _ROW_TILE_M = 512
    _FFN_VMEM = 80 << 20
    _GELU_DTYPE = jnp.bfloat16
else:                              # v7x (64 MiB physical) and unknown chips
    _FFN_TILE_M = 256
    _ROW_TILE_M = 256
    _FFN_VMEM = 48 << 20
    _GELU_DTYPE = jnp.bfloat16


def _tile_rows(m, target):
    """Largest row tile <= target that divides m and is sublane-aligned
    (multiple of 8), falling back to the full dimension."""
    t = min(target, m)
    for cand in range(t, 7, -1):
        if m % cand == 0 and cand % 8 == 0:
            return cand
    return m


# ----------------------------------------------------------------------------
# Pallas kernels
# ----------------------------------------------------------------------------

def _layernorm_kernel(x_ref, g_ref, b_ref, o_ref, *, eps):
    x = x_ref[...].astype(jnp.float32)
    mean = jnp.mean(x, axis=-1, keepdims=True)
    var = jnp.mean((x - mean) * (x - mean), axis=-1, keepdims=True)
    y = (x - mean) * jax.lax.rsqrt(var + eps) * g_ref[...] + b_ref[...]
    o_ref[...] = y.astype(o_ref.dtype)


def _attn_head_kernel(x_ref, bias_ref, qw_ref, kw_ref, vw_ref,
                      qb_ref, kb_ref, vb_ref, ow_ref, ob_ref, g_ref, be_ref,
                      o_ref, acc_ref, *, eps):
    """One (batch, head) grid step.

    Computes this head's Q/K/V projections from the resident [S, H] hidden
    tile, softmax(Q K^T + mask_bias) V with a single in-place [S, S] slab,
    and accumulates the per-head output projection into a [S, H] fp32
    scratch.  Last head: + o_bias + residual + LayerNorm -> output block.
    The attention scale 1/sqrt(HD) is pre-folded into the Q weights.
    """
    head = pl.program_id(1)
    n_heads = pl.num_programs(1)
    f32 = jnp.float32

    @pl.when(head == 0)
    def _():
        acc_ref[...] = jnp.zeros_like(acc_ref)

    x = x_ref[0]                                               # [S, H] bf16

    q = (jnp.dot(x, qw_ref[0], preferred_element_type=f32)
         + qb_ref[0]).astype(x.dtype)                          # [S, HD]
    k = (jnp.dot(x, kw_ref[0], preferred_element_type=f32)
         + kb_ref[0]).astype(x.dtype)
    v = (jnp.dot(x, vw_ref[0], preferred_element_type=f32)
         + vb_ref[0]).astype(x.dtype)

    # scores = q @ k^T: contract on HD directly (no in-kernel transpose).
    s = jax.lax.dot_general(q, k, (((1,), (1,)), ((), ())),
                            preferred_element_type=f32)        # [S, S]
    s = s + bias_ref[0]                      # additive key-padding mask bias
    s = jnp.exp(s - jnp.max(s, axis=-1, keepdims=True))        # in place
    p = s * pl.reciprocal(jnp.sum(s, axis=-1, keepdims=True), approx=True)

    ctx = jnp.dot(p.astype(v.dtype), v, preferred_element_type=f32)  # [S, HD]
    # Per-head slice of the output projection, accumulated into [S, H] fp32.
    acc_ref[...] += jnp.dot(ctx.astype(ow_ref.dtype), ow_ref[0],
                            preferred_element_type=f32)

    @pl.when(head == n_heads - 1)
    def _():
        z = acc_ref[...] + ob_ref[...] + x.astype(f32)
        mean = jnp.mean(z, axis=-1, keepdims=True)
        var = jnp.mean((z - mean) * (z - mean), axis=-1, keepdims=True)
        y = (z - mean) * jax.lax.rsqrt(var + eps) * g_ref[...] + be_ref[...]
        o_ref[...] = y[None].astype(o_ref.dtype)


def _ffn_ln_kernel(x_ref, w1_ref, b1_ref, w2_ref, b2_ref, g_ref, b_ref, o_ref,
                   *, eps, gelu_dtype):
    """o = LayerNorm(x + ff2(gelu(ff1(x)))); [tm, FFN] intermediate stays in
    VMEM.  GELU polynomial computed in bf16 on v6e/v7x, fp32 on v5e."""
    x = x_ref[...]                                             # [tm, H] bf16
    h = jnp.dot(x, w1_ref[...], preferred_element_type=jnp.float32) + b1_ref[...]
    # TODO(synk): HF DistilBERT uses exact erf-GELU; tanh approximation here.
    h = h.astype(gelu_dtype)
    c = math.sqrt(2.0 / math.pi)
    h = 0.5 * h * (1.0 + jnp.tanh(c * (h + 0.044715 * h * h * h)))
    y = jnp.dot(h.astype(w2_ref.dtype), w2_ref[...],
                preferred_element_type=jnp.float32) + b2_ref[...]
    z = y + x.astype(jnp.float32)
    mean = jnp.mean(z, axis=-1, keepdims=True)
    var = jnp.mean((z - mean) * (z - mean), axis=-1, keepdims=True)
    out = (z - mean) * jax.lax.rsqrt(var + eps) * g_ref[...] + b_ref[...]
    o_ref[...] = out.astype(o_ref.dtype)


def _classifier_kernel(x_ref, w_ref, b_ref, o_ref):
    """o = sigmoid(x @ w + b); N is lane-padded to a multiple of 128."""
    y = jnp.dot(x_ref[...], w_ref[...], preferred_element_type=jnp.float32)
    o_ref[...] = jax.nn.sigmoid(y + b_ref[...]).astype(o_ref.dtype)


# ----------------------------------------------------------------------------
# Pallas wrappers
# ----------------------------------------------------------------------------

def layernorm(x, g, b, *, eps=1e-12, tile_m=_ROW_TILE_M):
    M, H = x.shape
    tm = _tile_rows(M, tile_m)
    return pl.pallas_call(
        functools.partial(_layernorm_kernel, eps=eps),
        out_shape=jax.ShapeDtypeStruct((M, H), x.dtype),
        grid=(M // tm,),
        in_specs=[pl.BlockSpec((tm, H), lambda i: (i, 0)),
                  pl.BlockSpec((1, H), lambda i: (0, 0)),
                  pl.BlockSpec((1, H), lambda i: (0, 0))],
        out_specs=pl.BlockSpec((tm, H), lambda i: (i, 0)),
        compiler_params=pltpu.CompilerParams(dimension_semantics=("parallel",)),
    )(x, g, b)


def attention_block(x, bias, p, *, eps=1e-12):
    """LayerNorm(x + o_proj(softmax((x Wq)(x Wk)^T + bias)(x Wv)))."""
    B, S, H = x.shape
    NH = p["n_heads"]
    HD = H // NH

    x_spec = pl.BlockSpec((1, S, H), lambda b, h: (b, 0, 0))
    w_spec = pl.BlockSpec((1, H, HD), lambda b, h: (h, 0, 0))
    wb_spec = pl.BlockSpec((1, 1, HD), lambda b, h: (h, 0, 0))
    row_spec = pl.BlockSpec((1, H), lambda b, h: (0, 0))

    return pl.pallas_call(
        functools.partial(_attn_head_kernel, eps=eps),
        out_shape=jax.ShapeDtypeStruct((B, S, H), x.dtype),
        grid=(B, NH),
        in_specs=[x_spec,                                       # hidden / residual
                  pl.BlockSpec((1, 1, S), lambda b, h: (b, 0, 0)),  # mask bias
                  w_spec, w_spec, w_spec,                       # q/k/v weights
                  wb_spec, wb_spec, wb_spec,                    # q/k/v biases
                  pl.BlockSpec((1, HD, H), lambda b, h: (h, 0, 0)),  # o-proj slice
                  row_spec, row_spec, row_spec],                # o_b, ln g, ln b
        out_specs=x_spec,
        scratch_shapes=[pltpu.VMEM((S, H), jnp.float32)],       # o-proj accumulator
        compiler_params=pltpu.CompilerParams(
            dimension_semantics=("parallel", "arbitrary")),
    )(x, bias, p["q_w"], p["k_w"], p["v_w"],
      p["q_b"], p["k_b"], p["v_b"],
      p["o_w"], p["o_b"], p["ln1_g"], p["ln1_b"])


def ffn_ln(x, w1, b1, w2, b2, g, b, *, eps=1e-12, tile_m=_FFN_TILE_M):
    M, H = x.shape
    FF = w1.shape[1]
    tm = _tile_rows(M, tile_m)
    row_h = pl.BlockSpec((1, H), lambda i: (0, 0))
    return pl.pallas_call(
        functools.partial(_ffn_ln_kernel, eps=eps, gelu_dtype=_GELU_DTYPE),
        out_shape=jax.ShapeDtypeStruct((M, H), x.dtype),
        grid=(M // tm,),
        in_specs=[pl.BlockSpec((tm, H), lambda i: (i, 0)),
                  pl.BlockSpec((H, FF), lambda i: (0, 0)),
                  pl.BlockSpec((1, FF), lambda i: (0, 0)),
                  pl.BlockSpec((FF, H), lambda i: (0, 0)),
                  row_h, row_h, row_h],
        out_specs=pl.BlockSpec((tm, H), lambda i: (i, 0)),
        compiler_params=pltpu.CompilerParams(
            dimension_semantics=("parallel",),
            vmem_limit_bytes=_FFN_VMEM),
    )(x, w1, b1, w2, b2, g, b)


def classifier(x, w, b, num_labels):
    B = x.shape[0]
    n_pad = w.shape[1]                      # lane-padded to a multiple of 128
    out = pl.pallas_call(
        _classifier_kernel,
        out_shape=jax.ShapeDtypeStruct((B, n_pad), jnp.float32),
        in_specs=[_VMEM, _VMEM, _VMEM],
        out_specs=_VMEM,
    )(x, w, b)
    return out[:, :num_labels]


# ----------------------------------------------------------------------------
# DistilBERT-style model glue (embedding gather / reshapes in plain JAX)
# ----------------------------------------------------------------------------

def transformer_layer(h, mask_bias, p, B, S):
    H = h.shape[-1]
    # Attention (+ per-head QKV proj, o-proj, residual, LayerNorm): one kernel.
    h1 = attention_block(h, mask_bias, p)                       # [B, S, H]
    # FFN + residual + LayerNorm: one kernel.
    h2 = ffn_ln(h1.reshape(B * S, H), p["ff1_w"], p["ff1_b"],
                p["ff2_w"], p["ff2_b"], p["ln2_g"], p["ln2_b"])
    return h2.reshape(B, S, H)


def segment_classifier_forward(params, input_ids, attention_mask, num_labels):
    B, S = input_ids.shape
    H = params["word_emb"].shape[1]

    # Embeddings: word + learned positional, then LayerNorm (dropout = id).
    word = jnp.take(params["word_emb"], input_ids, axis=0)          # [B,S,H]
    pos = params["pos_emb"][:S][None, :, :]
    emb = (word + pos).reshape(B * S, H).astype(jnp.bfloat16)
    h = layernorm(emb, params["emb_ln_g"], params["emb_ln_b"]).reshape(B, S, H)

    # Additive key-padding mask bias, built once (0.0 keep / -1e9 pad).
    mask_bias = ((attention_mask.astype(jnp.float32) - 1.0) * 1e9
                 ).reshape(B, 1, S)

    for layer in params["layers"]:
        h = transformer_layer(h, mask_bias, layer, B, S)

    cls = h[:, 0, :]                                                # CLS token
    # dropout(0.3) is identity in eval; classifier + sigmoid fused in kernel.
    return classifier(cls, params["out_w"], params["out_b"], num_labels)


# ----------------------------------------------------------------------------
# Deterministic parameter init (fused / pre-transformed layouts)
# ----------------------------------------------------------------------------

def init_params(key, *, vocab, max_pos, hidden, n_heads, ffn, n_layers,
                num_labels):
    def init(k, shape):
        return 0.02 * jax.random.normal(k, shape, dtype=jnp.float32)

    bf16, f32 = jnp.bfloat16, jnp.float32
    hd = hidden // n_heads
    scale = 1.0 / math.sqrt(hd)

    def per_head_in(w):          # [H, H] -> [NH, H, HD] (column split by head)
        return w.reshape(hidden, n_heads, hd).transpose(1, 0, 2)

    ks = iter(jax.random.split(key, 3 + n_layers * 6))
    word_emb = init(next(ks), (vocab, hidden))
    pos_emb = init(next(ks), (max_pos, hidden))
    out_w = init(next(ks), (hidden, num_labels))
    n_pad = ((num_labels + 127) // 128) * 128       # lane-dense classifier out

    params = {
        "word_emb": word_emb,
        "pos_emb": pos_emb,
        "emb_ln_g": jnp.ones((1, hidden), f32),
        "emb_ln_b": jnp.zeros((1, hidden), f32),
        "layers": [],
        "out_w": jnp.zeros((hidden, n_pad), f32).at[:, :num_labels]
                    .set(out_w).astype(bf16),
        "out_b": jnp.zeros((1, n_pad), f32),
    }

    for _ in range(n_layers):
        q_w = init(next(ks), (hidden, hidden))
        k_w = init(next(ks), (hidden, hidden))
        v_w = init(next(ks), (hidden, hidden))
        o_w = init(next(ks), (hidden, hidden))
        ff1_w = init(next(ks), (hidden, ffn))
        ff2_w = init(next(ks), (ffn, hidden))
        params["layers"].append({
            "n_heads": n_heads,
            # Per-head input projections; 1/sqrt(HD) folded into q_w.
            "q_w": per_head_in(q_w * scale).astype(bf16),    # [NH, H, HD]
            "k_w": per_head_in(k_w).astype(bf16),
            "v_w": per_head_in(v_w).astype(bf16),
            "q_b": jnp.zeros((n_heads, 1, hd), f32),
            "k_b": jnp.zeros((n_heads, 1, hd), f32),
            "v_b": jnp.zeros((n_heads, 1, hd), f32),
            # o_w pre-reshaped to [NH, HD, H] for per-head accumulation.
            "o_w": o_w.reshape(n_heads, hd, hidden).astype(bf16),
            "o_b": jnp.zeros((1, hidden), f32),
            "ln1_g": jnp.ones((1, hidden), f32),
            "ln1_b": jnp.zeros((1, hidden), f32),
            "ff1_w": ff1_w.astype(bf16),
            "ff1_b": jnp.zeros((1, ffn), f32),
            "ff2_w": ff2_w.astype(bf16),
            "ff2_b": jnp.zeros((1, hidden), f32),
            "ln2_g": jnp.ones((1, hidden), f32),
            "ln2_b": jnp.zeros((1, hidden), f32),
        })
    return params


# ----------------------------------------------------------------------------
# Main
# ----------------------------------------------------------------------------

if __name__ == "__main__":
    # Small toy config (real DistilBERT: H=768, NH=12, FF=3072, S~512, L=6).
    B, S, H, NH, FF, L = 2, 8, 32, 4, 64, 2
    VOCAB, NUM_LABELS = 50, 3

    key = jax.random.PRNGKey(0)
    pkey, ikey = jax.random.split(key)

    params = init_params(pkey, vocab=VOCAB, max_pos=16, hidden=H, n_heads=NH,
                         ffn=FF, n_layers=L, num_labels=NUM_LABELS)

    input_ids = jax.random.randint(ikey, (B, S), 0, VOCAB, dtype=jnp.int32)
    attention_mask = jnp.array([[1, 1, 1, 1, 1, 1, 0, 0],
                                [1, 1, 1, 1, 1, 1, 1, 1]], dtype=jnp.int32)

    out = segment_classifier_forward(params, input_ids, attention_mask,
                                     NUM_LABELS)
    jax.block_until_ready(out)
    assert out.shape == (B, NUM_LABELS)
    print("KERNEL_OK")
</pallas_src>

<mosaic_0001>
module attributes {stable_mosaic.version = 11 : i64} {
  func.func @_layernorm_kernel(%arg0: i32, %arg1: memref<16x32xbf16, #tpu.memory_space<vmem>>, %arg2: memref<1x32xf32, #tpu.memory_space<vmem>>, %arg3: memref<1x32xf32, #tpu.memory_space<vmem>>, %arg4: memref<16x32xbf16, #tpu.memory_space<vmem>>) attributes {dimension_semantics = [#tpu.dimension_semantics<parallel>], iteration_bounds = array<i64: 1>, scalar_prefetch = 0 : i64, scratch_operands = 0 : i64, tpu.core_type = #tpu.core_type<tc>, window_params = [{transform_indices = @transform_0, window_bounds = array<i64: 16, 32>}, {pipeline_mode = #tpu.pipeline_mode<synchronous>, transform_indices = @transform_1, window_bounds = array<i64: 1, 32>}, {pipeline_mode = #tpu.pipeline_mode<synchronous>, transform_indices = @transform_2, window_bounds = array<i64: 1, 32>}, {transform_indices = @transform_3, window_bounds = array<i64: 16, 32>}]} {
    %c0 = arith.constant 0 : index
    %c0_0 = arith.constant 0 : index
    %0 = vector.load %arg1[%c0, %c0_0] : memref<16x32xbf16, #tpu.memory_space<vmem>>, vector<16x32xbf16>
    %1 = arith.extf %0 : vector<16x32xbf16> to vector<16x32xf32>
    %cst = arith.constant dense<0.000000e+00> : vector<16xf32>
    %2 = vector.multi_reduction <add>, %1, %cst [1] : vector<16x32xf32> to vector<16xf32>
    %3 = vector.shape_cast %2 : vector<16xf32> to vector<16x1xf32>
    %cst_1 = arith.constant 3.200000e+01 : f32
    %4 = vector.broadcast %cst_1 : f32 to vector<16x1xf32>
    %5 = arith.divf %3, %4 : vector<16x1xf32>
    %6 = vector.broadcast %5 : vector<16x1xf32> to vector<16x32xf32>
    %7 = arith.subf %1, %6 : vector<16x32xf32>
    %8 = vector.broadcast %5 : vector<16x1xf32> to vector<16x32xf32>
    %9 = arith.subf %1, %8 : vector<16x32xf32>
    %10 = arith.mulf %7, %9 : vector<16x32xf32>
    %cst_2 = arith.constant dense<0.000000e+00> : vector<16xf32>
    %11 = vector.multi_reduction <add>, %10, %cst_2 [1] : vector<16x32xf32> to vector<16xf32>
    %12 = vector.shape_cast %11 : vector<16xf32> to vector<16x1xf32>
    %cst_3 = arith.constant 3.200000e+01 : f32
    %13 = vector.broadcast %cst_3 : f32 to vector<16x1xf32>
    %14 = arith.divf %12, %13 : vector<16x1xf32>
    %15 = vector.broadcast %5 : vector<16x1xf32> to vector<16x32xf32>
    %16 = arith.subf %1, %15 : vector<16x32xf32>
    %cst_4 = arith.constant 9.99999996E-13 : f32
    %17 = vector.broadcast %cst_4 : f32 to vector<16x1xf32>
    %18 = arith.addf %14, %17 : vector<16x1xf32>
    %19 = math.rsqrt %18 : vector<16x1xf32>
    %20 = vector.broadcast %19 : vector<16x1xf32> to vector<16x32xf32>
    %21 = arith.mulf %16, %20 : vector<16x32xf32>
    %c0_5 = arith.constant 0 : index
    %c0_6 = arith.constant 0 : index
    %22 = vector.load %arg2[%c0_5, %c0_6] : memref<1x32xf32, #tpu.memory_space<vmem>>, vector<1x32xf32>
    %23 = vector.broadcast %22 : vector<1x32xf32> to vector<16x32xf32>
    %24 = arith.mulf %21, %23 : vector<16x32xf32>
    %c0_7 = arith.constant 0 : index
    %c0_8 = arith.constant 0 : index
    %25 = vector.load %arg3[%c0_7, %c0_8] : memref<1x32xf32, #tpu.memory_space<vmem>>, vector<1x32xf32>
    %26 = vector.broadcast %25 : vector<1x32xf32> to vector<16x32xf32>
    %27 = arith.addf %24, %26 : vector<16x32xf32>
    %28 = arith.truncf %27 : vector<16x32xf32> to vector<16x32xbf16>
    %c0_9 = arith.constant 0 : index
    %c0_10 = arith.constant 0 : index
    %29 = vector.load %arg4[%c0_9, %c0_10] : memref<16x32xbf16, #tpu.memory_space<vmem>>, vector<16x32xbf16>
    tpu.vector_store %arg4[%c0_9, %c0_10], %28 {strides = array<i32>} : memref<16x32xbf16, #tpu.memory_space<vmem>>, vector<16x32xbf16>,
    return
  }
  func.func @transform_0(%arg0: i32) -> (i32, i32) {
    %c0_i32 = arith.constant 0 : i32
    %c0_i32_0 = arith.constant 0 : i32
    return %arg0, %c0_i32 : i32, i32
  }
  func.func @transform_1(%arg0: i32) -> (i32, i32) {
    %c0_i32 = arith.constant 0 : i32
    %c0_i32_0 = arith.constant 0 : i32
    %c0_i32_1 = arith.constant 0 : i32
    return %c0_i32, %c0_i32_0 : i32, i32
  }
  func.func @transform_2(%arg0: i32) -> (i32, i32) {
    %c0_i32 = arith.constant 0 : i32
    %c0_i32_0 = arith.constant 0 : i32
    %c0_i32_1 = arith.constant 0 : i32
    return %c0_i32, %c0_i32_0 : i32, i32
  }
  func.func @transform_3(%arg0: i32) -> (i32, i32) {
    %c0_i32 = arith.constant 0 : i32
    %c0_i32_0 = arith.constant 0 : i32
    return %arg0, %c0_i32 : i32, i32
  }
}

</mosaic_0001>

<bundles_post_ra>
// kernel: tpu_custom_call.1
= control target key start
LH: loop header
LB: loop body
LE: loop exit
PB: predicated region body
PF: predicated region fallthrough
CT: control target
= control target key end

     0   :  { %8 = vsyncpa [#allocation3], 0  ;;  %s237_s0 = inlined_call_operand.hbm [shape: bf16[16,32], index: 0, kind: input, shape index: {}]   ;;  %s238_s1 = inlined_call_operand.vmem [shape: f32[1,32], index: 1, kind: input, shape index: {}]   ;;  %s239_s2 = inlined_call_operand.vmem [shape: f32[1,32], index: 2, kind: input, shape index: {}]   ;;  %s240_s3 = inlined_call_operand.hbm [shape: bf16[16,32], index: 3, kind: output, shape index: {}]  }
   0x1   :  { %9 = vsyncpa [#allocation4], 0  ;;  %s173_s12 = smov [#allocation2]   ;;  %s125_s16 = scalar_lea.hbm %s237_s0, 128 }
   0x2   :  { %s15_s13 = sshll.u32 %s173_s12, 4  ;;  %p126_p0 = scmp.ne.s32.totalorder %s237_s0, %s125_s16  ;;  %s16_s13 = int_to_ptr.vmem [resolvable:$true] %s15_s13 }
   0x3   :  { %p129_p1 = scmp.lt.u32.totalorder %s125_s16, %s237_s0 }
   0x5   :  { %p131_p2 = pnand %p129_p1, %p126_p0 }
   0x7   :  { %134 = shalt.err (!%p131_p2)
}
   0x8   :  { %s135_s21 = scalar_lea.vmem %s16_s13, 128  ;;  %p140_p4 = scmp.lt.s32.totalorder %s16_s13, %s16_s13 }
   0x9   :  { %p136_p3 = scmp.ne.s32.totalorder %s16_s13, %s135_s21  ;;  %p141_p5 = scmp.lt.s32.totalorder %s135_s21, %s135_s21 }
   0xb   :  { %p142_p6 = por %p141_p5, %p140_p4 }
   0xd   :  { %p143_p7 = pnand %p142_p6, %p136_p3 }
   0xf   :  { %146 = shalt.err (!%p143_p7)
}
  0x10   :  { %s174_s22 = smov 64   ;;  %s175_s23 = smov 4  }
  0x11   :  { %21 = dma.hbm_to_vmem [thread:$0]  %s237_s0, 128, %s16_s13, [#allocation3], %s174_s22, %s174_s22, %s175_s23  }
  0x12   :  { %169 = dma.done.wait [#allocation3], 128  }
  0x13   :  { %170 = vsyncadd [#allocation3], 4294967168  ;;  %v114_v0 = vld [vmem:[#allocation2] sm:$0xff]   ;;  %vm33_vm0 = vcmask 261120   ;;  %vm87_vm1 = vcmask 257024   ;;  %s176_s29 = smov [#allocation5]  }
  0x14   :  { %v115_v1 = vunpack.c.l.bf16 %v114_v0  ;;  %v116_v2 = vunpack.c.h.bf16 %v114_v0  ;;  %v107_v22 = vld [vmem:[%s238_s1] ss:$0 sm:$0xff]  ;;  %s95_s30 = sshll.u32 %s176_s29, 4  ;;  %s96_s30 = int_to_ptr.vmem [resolvable:$true] %s95_s30 }
  0x15   :  { %v108_v24 = vld [vmem:[%s239_s2] ss:$0 sm:$0xff]  ;;  %s147_s1 = scalar_lea.vmem %s96_s30, 128  ;;  %p152_p9 = scmp.lt.s32.totalorder %s96_s30, %s96_s30 }
  0x16   :  { %v34_v3 = vsel %vm33_vm0, %v115_v1, 0.0  ;;  %v37_v4 = vsel %vm33_vm0, %v116_v2, 0.0  ;;  %p148_p8 = scmp.ne.s32.totalorder %s96_s30, %s147_s1  ;;  %p153_p10 = scmp.lt.s32.totalorder %s147_s1, %s147_s1 }
  0x17   :  { %35 = vadd.xlane.f32.xlu0 %v34_v3 }
  0x18   :  { %p154_p11 = por %p153_p10, %p152_p9 }
  0x1a   :  { %p155_p12 = pnand %p154_p11, %p148_p8 }
  0x1b   :  { %38 = vadd.xlane.f32.xlu0 %v37_v4 }
  0xa4   :  { %v36_v5 = vpop.xlane.xlu0 %35 }
  0xa5   :  { %v41_v6 = vmul.f32 0.03125, %v36_v5 }
  0xa7   :  { %v43_v7 = vsub.f32 %v115_v1, %v41_v6 }
  0xa8   :  { %v39_v8 = vpop.xlane.xlu0 %38 }
  0xa9   :  { %v42_v9 = vmul.f32 0.03125, %v39_v8  ;;  %v45_v10 = vmul.f32 %v43_v7, %v43_v7 }
  0xab   :  { %v44_v11 = vsub.f32 %v116_v2, %v42_v9  ;;  %v47_v12 = vsel %vm33_vm0, %v45_v10, 0.0 }
  0xac   :  { %48 = vadd.xlane.f32.xlu1 %v47_v12 }
  0xad   :  { %v46_v13 = vmul.f32 %v44_v11, %v44_v11 }
  0xaf   :  { %v50_v14 = vsel %vm33_vm0, %v46_v13, 0.0 }
  0xb0   :  { %51 = vadd.xlane.f32.xlu1 %v50_v14 }
 0x139   :  { %v49_v15 = vpop.xlane.xlu1 %48 }
 0x13a   :  { %v53_v16 = vmul.f32 0.03125, %v49_v15 }
 0x13c   :  { %v55_v17 = vadd.f32 1e-12, %v53_v16 }
 0x13d   :  { %v52_v18 = vpop.xlane.xlu1 %51 }
 0x13e   :  { %121 = vrsqrt.f32 %v55_v17  ;;  %v54_v19 = vmul.f32 0.03125, %v52_v18 }
 0x140   :  { %v56_v20 = vadd.f32 1e-12, %v54_v19 }
 0x142   :  { %123 = vrsqrt.f32 %v56_v20 }
 0x148   :  { %v122_v21 = vpop.eup %121 }
 0x149   :  { %v59_v23 = vmul.f32 %v122_v21, %v43_v7 }
 0x14b   :  { %v68_v25 = vmul.f32 %v107_v22, %v59_v23 }
 0x14c   :  { %v124_v26 = vpop.eup %123 }
 0x14d   :  { %v60_v27 = vmul.f32 %v124_v26, %v44_v11  ;;  %v77_v28 = vadd.f32 %v108_v24, %v68_v25 }
 0x14f   :  { %v69_v29 = vmul.f32 %v107_v22, %v60_v27  ;;  %v111_v30 = vpack.c.bf16 %v77_v28, %v77_v28 }
 0x151   :  { %v78_v31 = vadd.f32 %v108_v24, %v69_v29  ;;  %88 = vst.msk [vmem:[#allocation5] sm:$0xf] %vm87_vm1, %v111_v30 }
 0x153   :  { %v112_v32 = vpack.c.bf16 %v78_v31, %v78_v31 }
 0x155   :  { %89 = vst.msk [vmem:[#allocation5 + $0x4] sm:$0xf] %vm87_vm1, %v112_v32 }
 0x156   :  { %158 = shalt.err (!%p155_p12)
}
 0x157   :  { %s159_s5 = scalar_lea.hbm %s240_s3, 128 }
 0x158   :  { %p160_p13 = scmp.ne.s32.totalorder %s240_s3, %s159_s5  ;;  %p163_p0 = scmp.lt.u32.totalorder %s159_s5, %s240_s3 }
 0x15a   :  { %p165_p1 = pnand %p163_p0, %p160_p13 }
 0x15c   :  { %168 = shalt.err (!%p165_p1)
}
 0x15d   :  { %101 = dma.vmem_to_hbm [thread:$0]  %s96_s30, 128, %s240_s3, [#allocation4], %s174_s22, %s174_s22, %s175_s23  }
 0x15e   :  { %171 = dma.done.wait [#allocation4], 128  }
 0x15f   :  { %172 = vsyncadd [#allocation4], 4294967168 }
 0x160   :  { %105 = vsyncpa [#allocation3], 1 }
 0x161   :  { %106 = vsyncpa [#allocation4], 1 }

</bundles_post_ra>
